<compile_context>
chip_gen: v6e
topology: v6e:2x2x1
jax: 0.10.0
libtpu: 0.0.40
codegen_flags: <defaults>
</compile_context>

<pallas_src>
import math

import jax
import jax.numpy as jnp
from jax.experimental import pallas as pl
from jax.experimental.pallas import tpu as pltpu

_VMEM_LIMIT = 48 * 1024 * 1024  # <= 0.75x of v7x's 64 MiB physical VMEM


def _rup(c, m=128):
    return ((c + m - 1) // m) * m


# ------------------------- Pallas kernels -------------------------------------


def _mm_kernel(relu6, has_sc):
    """Fused: x@w (+ x_sc@w_sc) + bias (+relu6). BN scale is pre-folded into w."""
    if has_sc:
        def kernel(x_ref, w_ref, xs_ref, ws_ref, b_ref, o_ref):
            y = jnp.dot(x_ref[...], w_ref[...], preferred_element_type=jnp.float32)
            y = y + jnp.dot(xs_ref[...], ws_ref[...],
                            preferred_element_type=jnp.float32)
            y = y + b_ref[...]
            if relu6:
                y = jnp.clip(y, 0.0, 6.0)
            o_ref[...] = y.astype(o_ref.dtype)
    else:
        def kernel(x_ref, w_ref, b_ref, o_ref):
            y = jnp.dot(x_ref[...], w_ref[...], preferred_element_type=jnp.float32)
            y = y + b_ref[...]
            if relu6:
                y = jnp.clip(y, 0.0, 6.0)
            o_ref[...] = y.astype(o_ref.dtype)
    return kernel


def matmul_bias_act(x, w, bias, relu6, x_sc=None, w_sc=None,
                    out_dtype=jnp.bfloat16, tm=512):
    """(M,K)@(K,N) [+ (M,Ks)@(Ks,N)] + bias (+relu6), tiled over M."""
    M, K = x.shape
    N = w.shape[1]
    TM = M if M < tm else tm                       # TM==M (full) or 512 (8-aligned)
    grid = (pl.cdiv(M, TM),)
    in_specs = [pl.BlockSpec((TM, K), lambda i: (i, 0)),
                pl.BlockSpec((K, N), lambda i: (0, 0))]
    args = [x.astype(jnp.bfloat16), w]
    has_sc = x_sc is not None
    if has_sc:
        Ks = x_sc.shape[1]
        in_specs.append(pl.BlockSpec((TM, Ks), lambda i: (i, 0)))
        in_specs.append(pl.BlockSpec((Ks, N), lambda i: (0, 0)))
        args += [x_sc.astype(jnp.bfloat16), w_sc]
    in_specs.append(pl.BlockSpec((1, N), lambda i: (0, 0)))
    args.append(bias.reshape(1, N).astype(jnp.float32))
    return pl.pallas_call(
        _mm_kernel(relu6, has_sc),
        out_shape=jax.ShapeDtypeStruct((M, N), out_dtype),
        grid=grid,
        in_specs=in_specs,
        out_specs=pl.BlockSpec((TM, N), lambda i: (i, 0)),
        compiler_params=pltpu.CompilerParams(
            dimension_semantics=("parallel",),
            vmem_limit_bytes=_VMEM_LIMIT),
    )(*args)


def _dw_kernel(Hout, Wout, stride):
    """3x3 depthwise conv + bias + relu6.

    Inputs: stride*stride phase refs (the padded activation subsampled by
    `stride` along H and W), a (9, CB) weight ref (BN-scale folded in) and a
    (1, CB) bias ref.  Only full-block ref loads/stores are used; the 9 taps
    are static unit-stride slices of the loaded arrays.
    """
    nph = stride * stride

    def kernel(*refs):
        phase_refs = refs[:nph]
        w_ref, b_ref, o_ref = refs[nph], refs[nph + 1], refs[nph + 2]
        wv = w_ref[...]                                 # (9, CB) f32
        bv = b_ref[...]                                 # (1, CB) f32
        xs = [pr[...] for pr in phase_refs]             # each (1, Hph, Wph, CB)
        acc = None
        for dy in range(3):
            for dx in range(3):
                pidx = (dy % stride) * stride + (dx % stride)
                r0 = dy // stride
                c0 = dx // stride
                tap = xs[pidx][0, r0:r0 + Hout, c0:c0 + Wout, :]
                t = tap.astype(jnp.float32) * wv[3 * dy + dx, :]
                acc = t if acc is None else acc + t
        y = acc + bv[0, :]
        y = jnp.clip(y, 0.0, 6.0)
        o_ref[...] = y[None].astype(o_ref.dtype)
    return kernel


def _pick_channel_block(cp, hw_padded, budget_bytes=4 * 1024 * 1024):
    """Largest multiple-of-128 divisor of cp whose bf16 spatial tile fits budget."""
    cb = cp
    while cb >= 128:
        if cp % cb == 0 and cb % 128 == 0 and hw_padded * cb * 2 <= budget_bytes:
            return cb
        cb -= 128
    return 128


def depthwise3x3_bn_relu6(x, w9, bias, stride):
    """x (N,H,W,Cp) bf16, w9 (9,Cp) f32 (BN-scale folded), bias (Cp,) f32."""
    N, H, W, Cp = x.shape
    Hout = (H + 2 - 3) // stride + 1
    Wout = (W + 2 - 3) // stride + 1
    xp = jnp.pad(x, ((0, 0), (1, 1), (1, 1), (0, 0)))
    Hp, Wp = H + 2, W + 2
    CB = _pick_channel_block(Cp, Hp * Wp)

    # Phase decomposition (JAX side): for stride s, s*s subsampled views of the
    # padded activation.  Total bytes == padded activation; taps inside the
    # kernel become unit-stride static slices.
    phases = []
    for py in range(stride):
        for px in range(stride):
            phases.append(xp[:, py::stride, px::stride, :])

    in_specs = []
    for ph in phases:
        _, Hph, Wph, _ = ph.shape
        in_specs.append(pl.BlockSpec((1, Hph, Wph, CB), lambda n, c: (n, 0, 0, c)))
    in_specs.append(pl.BlockSpec((9, CB), lambda n, c: (0, c)))
    in_specs.append(pl.BlockSpec((1, CB), lambda n, c: (0, c)))

    return pl.pallas_call(
        _dw_kernel(Hout, Wout, stride),
        out_shape=jax.ShapeDtypeStruct((N, Hout, Wout, Cp), jnp.bfloat16),
        grid=(N, Cp // CB),
        in_specs=in_specs,
        out_specs=pl.BlockSpec((1, Hout, Wout, CB), lambda n, c: (n, 0, 0, c)),
        compiler_params=pltpu.CompilerParams(
            dimension_semantics=("parallel", "parallel"),
            vmem_limit_bytes=_VMEM_LIMIT),
    )(*phases, w9, bias.reshape(1, Cp))


def _avgpool_kernel(x_ref, o_ref):
    o_ref[...] = jnp.mean(x_ref[...].astype(jnp.float32), axis=1)


def global_avgpool(x_nhwc):
    N, H, W, C = x_nhwc.shape
    x = x_nhwc.reshape(N, H * W, C)
    return pl.pallas_call(
        _avgpool_kernel,
        out_shape=jax.ShapeDtypeStruct((N, C), jnp.float32),
        grid=(1,),
        in_specs=[pl.BlockSpec((N, H * W, C), lambda i: (0, 0, 0))],
        out_specs=pl.BlockSpec((N, C), lambda i: (0, 0)),
        compiler_params=pltpu.CompilerParams(
            dimension_semantics=("arbitrary",),
            vmem_limit_bytes=_VMEM_LIMIT),
    )(x)


# ------------------------- layer wrappers -------------------------------------


def block_forward(x, p):
    """Inverted-residual block on channel-padded bf16 NHWC activations."""
    N, H, W, Cin_p = x.shape
    M = N * H * W
    h = matmul_bias_act(x.reshape(M, Cin_p), p["w1"], p["b1"], relu6=True)
    h = h.reshape(N, H, W, -1)
    h = depthwise3x3_bn_relu6(h, p["w2"], p["b2"], p["stride"])
    N2, H2, W2, Cmid_p = h.shape
    M2 = N2 * H2 * W2
    # Note: residual only when stride==1 AND in_planes != out_planes (matching
    # the reference module, which differs from standard MobileNetV2).
    if p["has_sc"]:
        out = matmul_bias_act(h.reshape(M2, Cmid_p), p["w3"], p["b3"], relu6=False,
                              x_sc=x.reshape(M, Cin_p), w_sc=p["ws"])
    else:
        out = matmul_bias_act(h.reshape(M2, Cmid_p), p["w3"], p["b3"], relu6=False)
    return out.reshape(N2, H2, W2, -1)


# ------------------------- raw parameters (PyTorch layouts) --------------------

CFG = [(1, 16, 1, 1), (6, 24, 2, 2), (6, 32, 3, 2), (6, 64, 4, 2),
       (6, 96, 3, 1), (6, 160, 3, 2), (6, 320, 1, 1)]
CH_WIDTH = [32, 32, 16, 96, 24, 144, 24, 144, 32, 192, 32, 192, 32, 192,
            64, 384, 64, 384, 64, 384, 64, 384, 96, 576, 96, 576, 96, 576,
            160, 960, 160, 960, 160, 960, 320, 1280]


def _conv_w(key, cout, cin, k):
    fan = cin * k * k
    return jax.random.normal(key, (cout, cin, k, k), jnp.float32) / math.sqrt(fan)


def _bn(key, c, eps=1e-5):
    k1, k2, k3, k4 = jax.random.split(key, 4)
    gamma = 1.0 + 0.1 * jax.random.normal(k1, (c,), jnp.float32)
    beta = 0.1 * jax.random.normal(k2, (c,), jnp.float32)
    mean = 0.1 * jax.random.normal(k3, (c,), jnp.float32)
    var = 1.0 + 0.1 * jnp.abs(jax.random.normal(k4, (c,), jnp.float32))
    scale = gamma / jnp.sqrt(var + eps)
    bias = beta - mean * scale
    return scale, bias


def init_params(key, num_classes=1000):
    ki = iter(jax.random.split(key, 256))
    params = {}
    params["conv1_w"] = _conv_w(next(ki), CH_WIDTH[0], 3, 3)
    params["bn1_s"], params["bn1_b"] = _bn(next(ki), CH_WIDTH[0])
    blocks = []
    in_planes = 32
    count = 0
    for expansion, out_planes, num_blocks, stride0 in CFG:
        for s in [stride0] + [1] * (num_blocks - 1):
            w = count * 2
            ch_in, ch_mid, ch_out = CH_WIDTH[w], CH_WIDTH[w + 1], CH_WIDTH[w + 2]
            p = {"stride": s}
            p["w1"] = _conv_w(next(ki), ch_mid, ch_in, 1)
            p["s1"], p["b1"] = _bn(next(ki), ch_mid)
            p["w2"] = _conv_w(next(ki), ch_mid, 1, 3)        # depthwise (C,1,3,3)
            p["s2"], p["b2"] = _bn(next(ki), ch_mid)
            p["w3"] = _conv_w(next(ki), ch_out, ch_mid, 1)
            p["s3"], p["b3"] = _bn(next(ki), ch_out)
            if s == 1 and in_planes != out_planes:
                p["ws"] = _conv_w(next(ki), ch_out, ch_in, 1)
                p["ss"], p["bs"] = _bn(next(ki), ch_out)
            blocks.append(p)
            in_planes = out_planes
            count += 1
    params["blocks"] = blocks
    params["conv2_w"] = _conv_w(next(ki), CH_WIDTH[35], CH_WIDTH[34], 1)
    params["bn2_s"], params["bn2_b"] = _bn(next(ki), CH_WIDTH[35])
    params["lin_w"] = jax.random.normal(
        next(ki), (num_classes, CH_WIDTH[35]), jnp.float32) / math.sqrt(CH_WIDTH[35])
    params["lin_b"] = 0.01 * jax.random.normal(next(ki), (num_classes,), jnp.float32)
    return params


# ------------------------- BN folding + channel padding ------------------------


def _prep_pw(w_oihw, scale, bias):
    """1x1 conv (Cout,Cin,1,1) + BN -> bf16 (Kp,Np) weight (scale folded), f32 bias."""
    Cout, Cin = w_oihw.shape[0], w_oihw.shape[1]
    Kp, Np = _rup(Cin), _rup(Cout)
    wm = w_oihw.reshape(Cout, Cin).T * scale[None, :]
    wm = jnp.pad(wm, ((0, Kp - Cin), (0, Np - Cout))).astype(jnp.bfloat16)
    b = jnp.pad(bias, (0, Np - Cout)).astype(jnp.float32)
    return wm, b


def _prep_dw(w_dw, scale, bias):
    """Depthwise (C,1,3,3) + BN -> f32 (9,Cp) taps (scale folded), f32 bias."""
    C = w_dw.shape[0]
    Cp = _rup(C)
    w9 = jnp.transpose(w_dw.reshape(C, 9), (1, 0)) * scale[None, :]
    w9 = jnp.pad(w9, ((0, 0), (0, Cp - C))).astype(jnp.float32)
    b = jnp.pad(bias, (0, Cp - C)).astype(jnp.float32)
    return w9, b


def _prep_stem(w_oihw, scale, bias):
    """Dense 3x3 stem conv + BN -> im2col weight (K=27 padded to 32, Np=128)."""
    Cout = w_oihw.shape[0]
    Np = _rup(Cout)
    K, Kp = 27, 32
    wm = jnp.transpose(w_oihw, (2, 3, 1, 0)).reshape(K, Cout) * scale[None, :]
    wm = jnp.pad(wm, ((0, Kp - K), (0, Np - Cout))).astype(jnp.bfloat16)
    b = jnp.pad(bias, (0, Np - Cout)).astype(jnp.float32)
    return wm, b


def prepare_params(params):
    dp = {}
    dp["stem_w"], dp["stem_b"] = _prep_stem(
        params["conv1_w"], params["bn1_s"], params["bn1_b"])
    blocks = []
    for p in params["blocks"]:
        q = {"stride": p["stride"], "has_sc": ("ws" in p)}
        q["w1"], q["b1"] = _prep_pw(p["w1"], p["s1"], p["b1"])
        q["w2"], q["b2"] = _prep_dw(p["w2"], p["s2"], p["b2"])
        q["w3"], b3 = _prep_pw(p["w3"], p["s3"], p["b3"])
        if q["has_sc"]:
            q["ws"], bs = _prep_pw(p["ws"], p["ss"], p["bs"])
            q["b3"] = b3 + bs               # fused shortcut: biases add
        else:
            q["b3"] = b3
        blocks.append(q)
    dp["blocks"] = blocks
    dp["conv2_w"], dp["conv2_b"] = _prep_pw(
        params["conv2_w"], params["bn2_s"], params["bn2_b"])
    ncls = params["lin_w"].shape[0]
    np_cls = _rup(ncls)
    dp["lin_w"] = jnp.pad(params["lin_w"].T,
                          ((0, 0), (0, np_cls - ncls))).astype(jnp.bfloat16)
    dp["lin_b"] = jnp.pad(params["lin_b"], (0, np_cls - ncls)).astype(jnp.float32)
    dp["num_classes"] = ncls
    return dp


# ------------------------- full forward ----------------------------------------


def mobilenetv2_forward(x_nchw, dp):
    x = jnp.transpose(x_nchw, (0, 2, 3, 1)).astype(jnp.float32)   # NCHW -> NHWC
    N, H, W, Cin = x.shape

    # Stem: dense 3x3, stride 1, pad 1 via im2col (Cin=3 so the 9x copy is small).
    xp = jnp.pad(x, ((0, 0), (1, 1), (1, 1), (0, 0)))
    patches = jnp.concatenate(
        [xp[:, dy:dy + H, dx:dx + W, :] for dy in range(3) for dx in range(3)],
        axis=-1)                                                  # (N,H,W,27)
    patches = jnp.pad(patches, ((0, 0), (0, 0), (0, 0), (0, 32 - 9 * Cin)))
    h = matmul_bias_act(patches.reshape(N * H * W, 32).astype(jnp.bfloat16),
                        dp["stem_w"], dp["stem_b"], relu6=True)
    h = h.reshape(N, H, W, -1)

    for p in dp["blocks"]:
        h = block_forward(h, p)

    N2, H2, W2, Cp = h.shape
    h = matmul_bias_act(h.reshape(N2 * H2 * W2, Cp),
                        dp["conv2_w"], dp["conv2_b"], relu6=True)
    h = h.reshape(N2, H2, W2, -1)

    pooled = global_avgpool(h)                                    # (N, 1280) f32
    logits = matmul_bias_act(pooled.astype(jnp.bfloat16), dp["lin_w"], dp["lin_b"],
                             relu6=False, out_dtype=jnp.float32)
    return logits[:, :dp["num_classes"]]


if __name__ == "__main__":
    key = jax.random.PRNGKey(0)
    pkey, xkey = jax.random.split(key)
    raw_params = init_params(pkey, num_classes=1000)
    params = prepare_params(raw_params)
    x = jax.random.normal(xkey, (2, 3, 16, 16), jnp.float32)      # NCHW, like PyTorch
    logits = mobilenetv2_forward(x, params)
    jax.block_until_ready(logits)
    assert logits.shape == (2, 1000), logits.shape
    print("KERNEL_OK")
</pallas_src>

<mosaic_0001>
module attributes {stable_mosaic.version = 11 : i64} {
  func.func @kernel(%arg0: i32, %arg1: memref<512x32xbf16, #tpu.memory_space<vmem>>, %arg2: memref<32x128xbf16, #tpu.memory_space<vmem>>, %arg3: memref<1x128xf32, #tpu.memory_space<vmem>>, %arg4: memref<512x128xbf16, #tpu.memory_space<vmem>>) attributes {dimension_semantics = [#tpu.dimension_semantics<parallel>], iteration_bounds = array<i64: 1>, scalar_prefetch = 0 : i64, scratch_operands = 0 : i64, tpu.core_type = #tpu.core_type<tc>, window_params = [{transform_indices = @transform_0, window_bounds = array<i64: 512, 32>}, {pipeline_mode = #tpu.pipeline_mode<synchronous>, transform_indices = @transform_1, window_bounds = array<i64: 32, 128>}, {pipeline_mode = #tpu.pipeline_mode<synchronous>, transform_indices = @transform_2, window_bounds = array<i64: 1, 128>}, {transform_indices = @transform_3, window_bounds = array<i64: 512, 128>}]} {
    %c0 = arith.constant 0 : index
    %c0_0 = arith.constant 0 : index
    %0 = vector.load %arg1[%c0, %c0_0] : memref<512x32xbf16, #tpu.memory_space<vmem>>, vector<512x32xbf16>
    %c0_1 = arith.constant 0 : index
    %c0_2 = arith.constant 0 : index
    %1 = vector.load %arg2[%c0_1, %c0_2] : memref<32x128xbf16, #tpu.memory_space<vmem>>, vector<32x128xbf16>
    %cst = arith.constant dense<0.000000e+00> : vector<512x128xf32>
    %2 = tpu.matmul %0, %1, %cst {dimension_numbers = #tpu.dot_dimension_numbers<[1], [0], [0], [1], [0, 0, 1, 1], [], []>} : vector<512x32xbf16>, vector<32x128xbf16>, vector<512x128xf32> -> vector<512x128xf32>
    %c0_3 = arith.constant 0 : index
    %c0_4 = arith.constant 0 : index
    %3 = vector.load %arg3[%c0_3, %c0_4] : memref<1x128xf32, #tpu.memory_space<vmem>>, vector<1x128xf32>
    %4 = vector.broadcast %3 : vector<1x128xf32> to vector<512x128xf32>
    %5 = arith.addf %2, %4 : vector<512x128xf32>
    %cst_5 = arith.constant 0.000000e+00 : f32
    %cst_6 = arith.constant 6.000000e+00 : f32
    %6 = vector.broadcast %cst_5 : f32 to vector<512x128xf32>
    %7 = arith.maximumf %6, %5 : vector<512x128xf32>
    %8 = vector.broadcast %cst_6 : f32 to vector<512x128xf32>
    %9 = arith.minimumf %8, %7 : vector<512x128xf32>
    %10 = arith.truncf %9 : vector<512x128xf32> to vector<512x128xbf16>
    %c0_7 = arith.constant 0 : index
    %c0_8 = arith.constant 0 : index
    %11 = vector.load %arg4[%c0_7, %c0_8] : memref<512x128xbf16, #tpu.memory_space<vmem>>, vector<512x128xbf16>
    tpu.vector_store %arg4[%c0_7, %c0_8], %10 {strides = array<i32>} : memref<512x128xbf16, #tpu.memory_space<vmem>>, vector<512x128xbf16>,
    return
  }
  func.func @transform_0(%arg0: i32) -> (i32, i32) {
    %c0_i32 = arith.constant 0 : i32
    %c0_i32_0 = arith.constant 0 : i32
    return %arg0, %c0_i32 : i32, i32
  }
  func.func @transform_1(%arg0: i32) -> (i32, i32) {
    %c0_i32 = arith.constant 0 : i32
    %c0_i32_0 = arith.constant 0 : i32
    %c0_i32_1 = arith.constant 0 : i32
    return %c0_i32, %c0_i32_0 : i32, i32
  }
  func.func @transform_2(%arg0: i32) -> (i32, i32) {
    %c0_i32 = arith.constant 0 : i32
    %c0_i32_0 = arith.constant 0 : i32
    %c0_i32_1 = arith.constant 0 : i32
    return %c0_i32, %c0_i32_0 : i32, i32
  }
  func.func @transform_3(%arg0: i32) -> (i32, i32) {
    %c0_i32 = arith.constant 0 : i32
    %c0_i32_0 = arith.constant 0 : i32
    return %arg0, %c0_i32 : i32, i32
  }
}

</mosaic_0001>

<bundles_post_ra>
// kernel: tpu_custom_call.1
= control target key start
LH: loop header
LB: loop body
LE: loop exit
PB: predicated region body
PF: predicated region fallthrough
CT: control target
= control target key end

     0   :  { %vm263_vm0 = vcmask 261120   ;;  %s1893_s0 = inlined_call_operand.vmem [shape: bf16[512,32], index: 0, kind: input, shape index: {}]   ;;  %s1894_s1 = inlined_call_operand.vmem [shape: bf16[32,128], index: 1, kind: input, shape index: {}]   ;;  %s1895_s2 = inlined_call_operand.vmem [shape: f32[1,128], index: 2, kind: input, shape index: {}]   ;;  %s1896_s3 = inlined_call_operand.hbm [shape: bf16[512,128], index: 3, kind: output, shape index: {}]  }
   0x1   :  { %v1608_v0 = vld [vmem:[%s1894_s1 + $0x8] sm:$0xff]   ;;  %v1609_v1 = vld [vmem:[%s1894_s1] sm:$0xff]   ;;  %v1614_v6 = vld [vmem:[%s1893_s0 + $0x10] sm:$0xff]  }
   0x2   :  { %1533 = vmatprep.subr.bf16.mxu0 %v1608_v0  ;;  %1601 = vmatprep.subr.bf16.mxu1 %v1608_v0  ;;  %v1610_v2 = vld [vmem:[%s1893_s0] sm:$0xff]   ;;  %v1612_v4 = vld [vmem:[%s1893_s0 + $0x8] sm:$0xff]   ;;  %v1615_v7 = vld [vmem:[%s1893_s0 + $0x90] sm:$0xff]  }
   0x3   :  { %1534 = vmatpush3.bf16.msra.mxu0 %v1608_v0  ;;  %1603 = vmatpush3.bf16.msra.mxu1 %v1608_v0  ;;  %v1611_v3 = vld [vmem:[%s1893_s0 + $0x80] sm:$0xff]   ;;  %v1613_v5 = vld [vmem:[%s1893_s0 + $0x88] sm:$0xff]   ;;  %v1616_v8 = vld [vmem:[%s1893_s0 + $0x18] sm:$0xff]  }
   0x4   :  { %1535 = vmatprep.subr.bf16.mxu0 %v1609_v1  ;;  %1602 = vmatprep.subr.bf16.mxu1 %v1609_v1  ;;  %v1617_v9 = vld [vmem:[%s1893_s0 + $0x98] sm:$0xff]   ;;  %v1618_v10 = vld [vmem:[%s1893_s0 + $0x20] sm:$0xff]   ;;  %v1620_v12 = vld [vmem:[%s1893_s0 + $0x28] sm:$0xff]  }
   0x5   :  { %1537 = vmatprep.mubr.msk.bf16.mxu0 %vm263_vm0, %v1610_v2  ;;  %1569 = vmatprep.mubr.msk.bf16.mxu1 %vm263_vm0, %v1611_v3  ;;  %v1619_v11 = vld [vmem:[%s1893_s0 + $0xa0] sm:$0xff]   ;;  %v1621_v13 = vld [vmem:[%s1893_s0 + $0xa8] sm:$0xff]   ;;  %v1622_v14 = vld [vmem:[%s1893_s0 + $0x30] sm:$0xff]  }
   0x6   :  { %v1623_v15 = vld [vmem:[%s1893_s0 + $0xb0] sm:$0xff]   ;;  %v1624_v16 = vld [vmem:[%s1893_s0 + $0x38] sm:$0xff]   ;;  %v1626_v18 = vld [vmem:[%s1893_s0 + $0x40] sm:$0xff]  }
   0x7   :  { %1536 = vmatpush3.bf16.msra.mxu0 %v1609_v1  ;;  %1604 = vmatpush3.bf16.msra.mxu1 %v1609_v1  ;;  %v1625_v17 = vld [vmem:[%s1893_s0 + $0xb8] sm:$0xff]   ;;  %v1627_v19 = vld [vmem:[%s1893_s0 + $0xc0] sm:$0xff]  }
   0xa   :  { %1538 = vmatmul.mubr.msk.bf16.vlgmr.msra.gmra.mxu0 %vm263_vm0, %v1612_v4  ;;  %1570 = vmatmul.mubr.msk.bf16.vlgmr.msra.gmra.mxu1 %vm263_vm0, %v1613_v5 }
   0xb   :  { %1541 = vmatprep.mubr.msk.bf16.mxu0 %vm263_vm0, %v1614_v6  ;;  %1573 = vmatprep.mubr.msk.bf16.mxu1 %vm263_vm0, %v1615_v7 }
  0x12   :  { %1542 = vmatmul.mubr.msk.bf16.gmra.mxu0 %vm263_vm0, %v1616_v8  ;;  %1574 = vmatmul.mubr.msk.bf16.gmra.mxu1 %vm263_vm0, %v1617_v9 }
  0x13   :  { %1545 = vmatprep.mubr.msk.bf16.mxu0 %vm263_vm0, %v1618_v10  ;;  %1577 = vmatprep.mubr.msk.bf16.mxu1 %vm263_vm0, %v1619_v11 }
  0x1a   :  { %1546 = vmatmul.mubr.msk.bf16.gmra.mxu0 %vm263_vm0, %v1620_v12  ;;  %1578 = vmatmul.mubr.msk.bf16.gmra.mxu1 %vm263_vm0, %v1621_v13 }
  0x1b   :  { %1549 = vmatprep.mubr.msk.bf16.mxu0 %vm263_vm0, %v1622_v14  ;;  %1581 = vmatprep.mubr.msk.bf16.mxu1 %vm263_vm0, %v1623_v15 }
  0x22   :  { %1550 = vmatmul.mubr.msk.bf16.gmra.mxu0 %vm263_vm0, %v1624_v16  ;;  %1582 = vmatmul.mubr.msk.bf16.gmra.mxu1 %vm263_vm0, %v1625_v17 }
  0x23   :  { %8 = vsyncpa [#allocation3], 0  ;;  %1553 = vmatprep.mubr.msk.bf16.mxu0 %vm263_vm0, %v1626_v18  ;;  %1585 = vmatprep.mubr.msk.bf16.mxu1 %vm263_vm0, %v1627_v19  ;;  %v1628_v20 = vld [vmem:[%s1893_s0 + $0x48] sm:$0xff]   ;;  %v1630_v22 = vld [vmem:[%s1893_s0 + $0x50] sm:$0xff]  }
  0x24   :  { %v1629_v21 = vld [vmem:[%s1893_s0 + $0xc8] sm:$0xff]   ;;  %v1631_v23 = vld [vmem:[%s1893_s0 + $0xd0] sm:$0xff]   ;;  %v1632_v24 = vld [vmem:[%s1893_s0 + $0x58] sm:$0xff]  }
  0x25   :  { %v1633_v25 = vld [vmem:[%s1893_s0 + $0xd8] sm:$0xff]   ;;  %v1634_v26 = vld [vmem:[%s1893_s0 + $0x60] sm:$0xff]   ;;  %v1636_v28 = vld [vmem:[%s1893_s0 + $0x68] sm:$0xff]  }
  0x26   :  { %v1635_v27 = vld [vmem:[%s1893_s0 + $0xe0] sm:$0xff]   ;;  %v1637_v29 = vld [vmem:[%s1893_s0 + $0xe8] sm:$0xff]   ;;  %v1638_v30 = vld [vmem:[%s1893_s0 + $0x70] sm:$0xff]  }
  0x27   :  { %v1639_v31 = vld [vmem:[%s1893_s0 + $0xf0] sm:$0xff]   ;;  %v1640_v32 = vld [vmem:[%s1893_s0 + $0x78] sm:$0xff]   ;;  %v1824_v34 = vld [vmem:[%s1895_s2] ss:$0 sm:$0xff] }
  0x28   :  { %v1641_v33 = vld [vmem:[%s1893_s0 + $0xf8] sm:$0xff]   ;;  %s1664_s0 = smov [#allocation2]  }
  0x29   :  { %s1102_s2 = sshll.u32 %s1664_s0, 4  ;;  %s1103_s2 = int_to_ptr.vmem [resolvable:$true] %s1102_s2 }
  0x2a   :  { %1554 = vmatmul.mubr.msk.bf16.gmra.mxu0 %vm263_vm0, %v1628_v20  ;;  %1586 = vmatmul.mubr.msk.bf16.gmra.mxu1 %vm263_vm0, %v1629_v21  ;;  %s1642_s25 = scalar_lea.vmem %s1103_s2, 4096  ;;  %p1647_p1 = scmp.lt.s32.totalorder %s1103_s2, %s1103_s2 }
  0x2b   :  { %1557 = vmatprep.mubr.msk.bf16.mxu0 %vm263_vm0, %v1630_v22  ;;  %1589 = vmatprep.mubr.msk.bf16.mxu1 %vm263_vm0, %v1631_v23  ;;  %p1643_p0 = scmp.ne.s32.totalorder %s1103_s2, %s1642_s25  ;;  %p1648_p2 = scmp.lt.s32.totalorder %s1642_s25, %s1642_s25 }
  0x2d   :  { %p1649_p3 = por %p1648_p2, %p1647_p1 }
  0x2f   :  { %p1650_p4 = pnand %p1649_p3, %p1643_p0 }
  0x32   :  { %1558 = vmatmul.mubr.msk.bf16.gmra.mxu0 %vm263_vm0, %v1632_v24  ;;  %1590 = vmatmul.mubr.msk.bf16.gmra.mxu1 %vm263_vm0, %v1633_v25 }
  0x33   :  { %1561 = vmatprep.mubr.msk.bf16.mxu0 %vm263_vm0, %v1634_v26  ;;  %1593 = vmatprep.mubr.msk.bf16.mxu1 %vm263_vm0, %v1635_v27 }
  0x3a   :  { %1562 = vmatmul.mubr.msk.bf16.gmra.mxu0 %vm263_vm0, %v1636_v28  ;;  %1594 = vmatmul.mubr.msk.bf16.gmra.mxu1 %vm263_vm0, %v1637_v29 }
  0x3b   :  { %1565 = vmatprep.mubr.msk.bf16.mxu0 %vm263_vm0, %v1638_v30  ;;  %1597 = vmatprep.mubr.msk.bf16.mxu1 %vm263_vm0, %v1639_v31 }
  0x42   :  { %1566 = vmatmul.mubr.msk.bf16.gmra.mxu0 %vm263_vm0, %v1640_v32  ;;  %1598 = vmatmul.mubr.msk.bf16.gmra.mxu1 %vm263_vm0, %v1641_v33 }
  0xca   :  { %v1539_v35 = vpop.f32.mrf.mxu0  ;;  %v1571_v36 = vpop.f32.mrf.mxu1 }
  0xcb   :  { %v403_v37 = vadd.f32 %v1539_v35, %v1824_v34  ;;  %v531_v38 = vadd.f32 %v1571_v36, %v1824_v34 }
  0xcc   :  { %v394_v39 = vpop.f32.mrf.mxu0  ;;  %v522_v40 = vpop.f32.mrf.mxu1 }
  0xcd   :  { %v395_v41 = vadd.f32 %v1824_v34, %v394_v39  ;;  %v523_v42 = vadd.f32 %v1824_v34, %v522_v40  ;;  %v651_v45 = vmax.f32 %v403_v37, 0.0  ;;  %v683_v46 = vmax.f32 %v531_v38, 0.0 }
  0xce   :  { %v1540_v43 = vpop.f32.mrf.mxu0  ;;  %v1572_v44 = vpop.f32.mrf.mxu1 }
  0xcf   :  { %v406_v47 = vadd.f32 %v1540_v43, %v1824_v34  ;;  %v534_v48 = vadd.f32 %v1572_v44, %v1824_v34  ;;  %v649_v51 = vmax.f32 %v395_v41, 0.0  ;;  %v681_v52 = vmax.f32 %v523_v42, 0.0 }
  0xd0   :  { %v397_v49 = vpop.f32.mrf.mxu0  ;;  %v525_v50 = vpop.f32.mrf.mxu1  ;;  %v715_v59 = vmin.f32 %v651_v45, 6.0  ;;  %v747_v60 = vmin.f32 %v683_v46, 6.0 }
  0xd1   :  { %v398_v53 = vadd.f32 %v1824_v34, %v397_v49  ;;  %v526_v54 = vadd.f32 %v1824_v34, %v525_v50  ;;  %v652_v55 = vmax.f32 %v406_v47, 0.0  ;;  %v684_v56 = vmax.f32 %v534_v48, 0.0 }
  0xd2   :  { %v1543_v57 = vpop.f32.mrf.mxu0  ;;  %v1575_v58 = vpop.f32.mrf.mxu1  ;;  %v713_v5 = vmin.f32 %v649_v51, 6.0  ;;  %v745_v6 = vmin.f32 %v681_v52, 6.0 }
  0xd3   :  { %v650_v61 = vmax.f32 %v398_v53, 0.0  ;;  %v682_v62 = vmax.f32 %v526_v54, 0.0  ;;  %v716_v63 = vmin.f32 %v652_v55, 6.0  ;;  %v748_v0 = vmin.f32 %v684_v56, 6.0 }
  0xd4   :  { %v419_v1 = vadd.f32 %v1543_v57, %v1824_v34  ;;  %v547_v2 = vadd.f32 %v1575_v58, %v1824_v34  ;;  %v410_v3 = vpop.f32.mrf.mxu0  ;;  %v538_v4 = vpop.f32.mrf.mxu1 }
  0xd5   :  { %v714_v7 = vmin.f32 %v650_v61, 6.0  ;;  %v746_v8 = vmin.f32 %v682_v62, 6.0  ;;  %v1316_v9 = vpack.c.bf16 %v716_v63, %v715_v59  ;;  %v1396_v10 = vpack.c.bf16 %v748_v0, %v747_v60 }
  0xd6   :  { %v411_v11 = vadd.f32 %v1824_v34, %v410_v3  ;;  %v539_v12 = vadd.f32 %v1824_v34, %v538_v4  ;;  %v1544_v13 = vpop.f32.mrf.mxu0  ;;  %v1576_v14 = vpop.f32.mrf.mxu1  ;;  %v655_v17 = vmax.f32 %v419_v1, 0.0  ;;  %v687_v18 = vmax.f32 %v547_v2, 0.0 }
  0xd7   :  { %v1311_v15 = vpack.c.bf16 %v714_v7, %v713_v5  ;;  %v1391_v16 = vpack.c.bf16 %v746_v8, %v745_v6  ;;  %1468 = vst [vmem:[#allocation2 + $0x8] sm:$0xff] %v1316_v9   ;;  %1484 = vst [vmem:[#allocation2 + $0x88] sm:$0xff] %v1396_v10   ;;  %v422_v19 = vadd.f32 %v1544_v13, %v1824_v34 }
  0xd8   :  { %v550_v20 = vadd.f32 %v1576_v14, %v1824_v34  ;;  %v413_v21 = vpop.f32.mrf.mxu0  ;;  %v541_v22 = vpop.f32.mrf.mxu1  ;;  %v653_v23 = vmax.f32 %v411_v11, 0.0  ;;  %v685_v24 = vmax.f32 %v539_v12, 0.0  ;;  %v719_v36 = vmin.f32 %v655_v17, 6.0 }
  0xd9   :  { %1312 = vst [vmem:[#allocation2] sm:$0xff] %v1311_v15   ;;  %1483 = vst [vmem:[#allocation2 + $0x80] sm:$0xff] %v1391_v16   ;;  %v414_v25 = vadd.f32 %v1824_v34, %v413_v21  ;;  %v542_v26 = vadd.f32 %v1824_v34, %v541_v22  ;;  %v656_v27 = vmax.f32 %v422_v19, 0.0  ;;  %v751_v37 = vmin.f32 %v687_v18, 6.0 }
  0xda   :  { %v688_v28 = vmax.f32 %v550_v20, 0.0  ;;  %v1547_v29 = vpop.f32.mrf.mxu0  ;;  %v1579_v30 = vpop.f32.mrf.mxu1  ;;  %v717_v42 = vmin.f32 %v653_v23, 6.0  ;;  %v749_v43 = vmin.f32 %v685_v24, 6.0 }
  0xdb   :  { %v654_v31 = vmax.f32 %v414_v25, 0.0  ;;  %v686_v32 = vmax.f32 %v542_v26, 0.0  ;;  %v435_v33 = vadd.f32 %v1547_v29, %v1824_v34  ;;  %v563_v35 = vadd.f32 %v1579_v30, %v1824_v34 }
  0xdc   :  { %v720_v38 = vmin.f32 %v656_v27, 6.0  ;;  %v752_v39 = vmin.f32 %v688_v28, 6.0  ;;  %v426_v40 = vpop.f32.mrf.mxu0  ;;  %v554_v41 = vpop.f32.mrf.mxu1 }
  0xdd   :  { %v718_v44 = vmin.f32 %v654_v31, 6.0  ;;  %v750_v45 = vmin.f32 %v686_v32, 6.0  ;;  %v427_v48 = vadd.f32 %v1824_v34, %v426_v40  ;;  %v555_v49 = vadd.f32 %v1824_v34, %v554_v41 }
  0xde   :  { %v1326_v46 = vpack.c.bf16 %v720_v38, %v719_v36  ;;  %v1406_v47 = vpack.c.bf16 %v752_v39, %v751_v37  ;;  %v1548_v50 = vpop.f32.mrf.mxu0  ;;  %v1580_v51 = vpop.f32.mrf.mxu1  ;;  %v659_v54 = vmax.f32 %v435_v33, 0.0  ;;  %v691_v55 = vmax.f32 %v563_v35, 0.0 }
  0xdf   :  { %v1321_v52 = vpack.c.bf16 %v718_v44, %v717_v42  ;;  %v1401_v53 = vpack.c.bf16 %v750_v45, %v749_v43  ;;  %v438_v56 = vadd.f32 %v1548_v50, %v1824_v34  ;;  %v566_v57 = vadd.f32 %v1580_v51, %v1824_v34 }
  0xe0   :  { %1470 = vst [vmem:[#allocation2 + $0x18] sm:$0xff] %v1326_v46   ;;  %1486 = vst [vmem:[#allocation2 + $0x98] sm:$0xff] %v1406_v47   ;;  %v429_v58 = vpop.f32.mrf.mxu0  ;;  %v557_v59 = vpop.f32.mrf.mxu1  ;;  %v657_v60 = vmax.f32 %v427_v48, 0.0  ;;  %v689_v61 = vmax.f32 %v555_v49, 0.0  ;;  %v723_v4 = vmin.f32 %v659_v54, 6.0  ;;  %v755_v5 = vmin.f32 %v691_v55, 6.0 }
  0xe1   :  { %1469 = vst [vmem:[#allocation2 + $0x10] sm:$0xff] %v1321_v52   ;;  %1485 = vst [vmem:[#allocation2 + $0x90] sm:$0xff] %v1401_v53   ;;  %v430_v62 = vadd.f32 %v1824_v34, %v429_v58  ;;  %v558_v63 = vadd.f32 %v1824_v34, %v557_v59  ;;  %v660_v0 = vmax.f32 %v438_v56, 0.0  ;;  %v692_v1 = vmax.f32 %v566_v57, 0.0 }
  0xe2   :  { %v1551_v2 = vpop.f32.mrf.mxu0  ;;  %v1583_v3 = vpop.f32.mrf.mxu1  ;;  %v721_v14 = vmin.f32 %v657_v60, 6.0  ;;  %v753_v15 = vmin.f32 %v689_v61, 6.0 }
  0xe3   :  { %v658_v6 = vmax.f32 %v430_v62, 0.0  ;;  %v690_v7 = vmax.f32 %v558_v63, 0.0  ;;  %v724_v8 = vmin.f32 %v660_v0, 6.0  ;;  %v756_v9 = vmin.f32 %v692_v1, 6.0 }
  0xe4   :  { %v451_v10 = vadd.f32 %v1551_v2, %v1824_v34  ;;  %v579_v11 = vadd.f32 %v1583_v3, %v1824_v34  ;;  %v442_v12 = vpop.f32.mrf.mxu0  ;;  %v570_v13 = vpop.f32.mrf.mxu1 }
  0xe5   :  { %v722_v16 = vmin.f32 %v658_v6, 6.0  ;;  %v754_v17 = vmin.f32 %v690_v7, 6.0  ;;  %v1336_v18 = vpack.c.bf16 %v724_v8, %v723_v4  ;;  %v1416_v19 = vpack.c.bf16 %v756_v9, %v755_v5 }
  0xe6   :  { %v443_v20 = vadd.f32 %v1824_v34, %v442_v12  ;;  %v571_v21 = vadd.f32 %v1824_v34, %v570_v13  ;;  %v1552_v22 = vpop.f32.mrf.mxu0  ;;  %v1584_v23 = vpop.f32.mrf.mxu1  ;;  %v663_v26 = vmax.f32 %v451_v10, 0.0  ;;  %v695_v27 = vmax.f32 %v579_v11, 0.0 }
  0xe7   :  { %v1331_v24 = vpack.c.bf16 %v722_v16, %v721_v14  ;;  %v1411_v25 = vpack.c.bf16 %v754_v17, %v753_v15  ;;  %1472 = vst [vmem:[#allocation2 + $0x28] sm:$0xff] %v1336_v18   ;;  %1488 = vst [vmem:[#allocation2 + $0xa8] sm:$0xff] %v1416_v19   ;;  %v454_v28 = vadd.f32 %v1552_v22, %v1824_v34 }
  0xe8   :  { %v582_v29 = vadd.f32 %v1584_v23, %v1824_v34  ;;  %v445_v30 = vpop.f32.mrf.mxu0  ;;  %v573_v31 = vpop.f32.mrf.mxu1  ;;  %v661_v32 = vmax.f32 %v443_v20, 0.0  ;;  %v693_v33 = vmax.f32 %v571_v21, 0.0  ;;  %v727_v45 = vmin.f32 %v663_v26, 6.0 }
  0xe9   :  { %1471 = vst [vmem:[#allocation2 + $0x20] sm:$0xff] %v1331_v24   ;;  %1487 = vst [vmem:[#allocation2 + $0xa0] sm:$0xff] %v1411_v25   ;;  %v446_v35 = vadd.f32 %v1824_v34, %v445_v30  ;;  %v574_v36 = vadd.f32 %v1824_v34, %v573_v31  ;;  %v664_v37 = vmax.f32 %v454_v28, 0.0  ;;  %v759_v46 = vmin.f32 %v695_v27, 6.0 }
  0xea   :  { %v696_v38 = vmax.f32 %v582_v29, 0.0  ;;  %v1555_v39 = vpop.f32.mrf.mxu0  ;;  %v1587_v40 = vpop.f32.mrf.mxu1  ;;  %v725_v51 = vmin.f32 %v661_v32, 6.0  ;;  %v757_v52 = vmin.f32 %v693_v33, 6.0 }
  0xeb   :  { %v662_v41 = vmax.f32 %v446_v35, 0.0  ;;  %v694_v42 = vmax.f32 %v574_v36, 0.0  ;;  %v467_v43 = vadd.f32 %v1555_v39, %v1824_v34  ;;  %v595_v44 = vadd.f32 %v1587_v40, %v1824_v34 }
  0xec   :  { %v728_v47 = vmin.f32 %v664_v37, 6.0  ;;  %v760_v48 = vmin.f32 %v696_v38, 6.0  ;;  %v458_v49 = vpop.f32.mrf.mxu0  ;;  %v586_v50 = vpop.f32.mrf.mxu1 }
  0xed   :  { %v726_v53 = vmin.f32 %v662_v41, 6.0  ;;  %v758_v54 = vmin.f32 %v694_v42, 6.0  ;;  %v459_v57 = vadd.f32 %v1824_v34, %v458_v49  ;;  %v587_v58 = vadd.f32 %v1824_v34, %v586_v50 }
  0xee   :  { %v1346_v55 = vpack.c.bf16 %v728_v47, %v727_v45  ;;  %v1426_v56 = vpack.c.bf16 %v760_v48, %v759_v46  ;;  %v1556_v59 = vpop.f32.mrf.mxu0  ;;  %v1588_v60 = vpop.f32.mrf.mxu1  ;;  %v667_v63 = vmax.f32 %v467_v43, 0.0  ;;  %v699_v0 = vmax.f32 %v595_v44, 0.0 }
  0xef   :  { %v1341_v61 = vpack.c.bf16 %v726_v53, %v725_v51  ;;  %v1421_v62 = vpack.c.bf16 %v758_v54, %v757_v52  ;;  %v470_v1 = vadd.f32 %v1556_v59, %v1824_v34  ;;  %v598_v2 = vadd.f32 %v1588_v60, %v1824_v34 }
  0xf0   :  { %1474 = vst [vmem:[#allocation2 + $0x38] sm:$0xff] %v1346_v55   ;;  %1490 = vst [vmem:[#allocation2 + $0xb8] sm:$0xff] %v1426_v56   ;;  %v461_v3 = vpop.f32.mrf.mxu0  ;;  %v589_v4 = vpop.f32.mrf.mxu1  ;;  %v665_v5 = vmax.f32 %v459_v57, 0.0  ;;  %v697_v6 = vmax.f32 %v587_v58, 0.0  ;;  %v731_v13 = vmin.f32 %v667_v63, 6.0  ;;  %v763_v14 = vmin.f32 %v699_v0, 6.0 }
  0xf1   :  { %1473 = vst [vmem:[#allocation2 + $0x30] sm:$0xff] %v1341_v61   ;;  %1489 = vst [vmem:[#allocation2 + $0xb0] sm:$0xff] %v1421_v62   ;;  %v462_v7 = vadd.f32 %v1824_v34, %v461_v3  ;;  %v590_v8 = vadd.f32 %v1824_v34, %v589_v4  ;;  %v668_v9 = vmax.f32 %v470_v1, 0.0  ;;  %v700_v10 = vmax.f32 %v598_v2, 0.0 }
  0xf2   :  { %v1559_v11 = vpop.f32.mrf.mxu0  ;;  %v1591_v12 = vpop.f32.mrf.mxu1  ;;  %v729_v23 = vmin.f32 %v665_v5, 6.0  ;;  %v761_v24 = vmin.f32 %v697_v6, 6.0 }
  0xf3   :  { %v666_v15 = vmax.f32 %v462_v7, 0.0  ;;  %v698_v16 = vmax.f32 %v590_v8, 0.0  ;;  %v732_v17 = vmin.f32 %v668_v9, 6.0  ;;  %v764_v18 = vmin.f32 %v700_v10, 6.0 }
  0xf4   :  { %v483_v19 = vadd.f32 %v1559_v11, %v1824_v34  ;;  %v611_v20 = vadd.f32 %v1591_v12, %v1824_v34  ;;  %v474_v21 = vpop.f32.mrf.mxu0  ;;  %v602_v22 = vpop.f32.mrf.mxu1 }
  0xf5   :  { %v730_v25 = vmin.f32 %v666_v15, 6.0  ;;  %v762_v26 = vmin.f32 %v698_v16, 6.0  ;;  %v1356_v27 = vpack.c.bf16 %v732_v17, %v731_v13  ;;  %v1436_v28 = vpack.c.bf16 %v764_v18, %v763_v14 }
  0xf6   :  { %v475_v29 = vadd.f32 %v1824_v34, %v474_v21  ;;  %v603_v30 = vadd.f32 %v1824_v34, %v602_v22  ;;  %v1560_v31 = vpop.f32.mrf.mxu0  ;;  %v1592_v32 = vpop.f32.mrf.mxu1  ;;  %v671_v36 = vmax.f32 %v483_v19, 0.0  ;;  %v703_v37 = vmax.f32 %v611_v20, 0.0 }
  0xf7   :  { %v1351_v33 = vpack.c.bf16 %v730_v25, %v729_v23  ;;  %v1431_v35 = vpack.c.bf16 %v762_v26, %v761_v24  ;;  %1476 = vst [vmem:[#allocation2 + $0x48] sm:$0xff] %v1356_v27   ;;  %1492 = vst [vmem:[#allocation2 + $0xc8] sm:$0xff] %v1436_v28   ;;  %v486_v38 = vadd.f32 %v1560_v31, %v1824_v34 }
  0xf8   :  { %v614_v39 = vadd.f32 %v1592_v32, %v1824_v34  ;;  %v477_v40 = vpop.f32.mrf.mxu0  ;;  %v605_v41 = vpop.f32.mrf.mxu1  ;;  %v669_v42 = vmax.f32 %v475_v29, 0.0  ;;  %v701_v43 = vmax.f32 %v603_v30, 0.0  ;;  %v735_v54 = vmin.f32 %v671_v36, 6.0 }
  0xf9   :  { %1475 = vst [vmem:[#allocation2 + $0x40] sm:$0xff] %v1351_v33   ;;  %1491 = vst [vmem:[#allocation2 + $0xc0] sm:$0xff] %v1431_v35   ;;  %v478_v44 = vadd.f32 %v1824_v34, %v477_v40  ;;  %v606_v45 = vadd.f32 %v1824_v34, %v605_v41  ;;  %v672_v46 = vmax.f32 %v486_v38, 0.0  ;;  %v767_v55 = vmin.f32 %v703_v37, 6.0 }
  0xfa   :  { %v704_v47 = vmax.f32 %v614_v39, 0.0  ;;  %v1563_v48 = vpop.f32.mrf.mxu0  ;;  %v1595_v49 = vpop.f32.mrf.mxu1  ;;  %v733_v60 = vmin.f32 %v669_v42, 6.0  ;;  %v765_v61 = vmin.f32 %v701_v43, 6.0 }
  0xfb   :  { %v670_v50 = vmax.f32 %v478_v44, 0.0  ;;  %v702_v51 = vmax.f32 %v606_v45, 0.0  ;;  %v499_v52 = vadd.f32 %v1563_v48, %v1824_v34  ;;  %v627_v53 = vadd.f32 %v1595_v49, %v1824_v34 }
  0xfc   :  { %v736_v56 = vmin.f32 %v672_v46, 6.0  ;;  %v768_v57 = vmin.f32 %v704_v47, 6.0  ;;  %v490_v58 = vpop.f32.mrf.mxu0  ;;  %v618_v59 = vpop.f32.mrf.mxu1 }
  0xfd   :  { %v734_v62 = vmin.f32 %v670_v50, 6.0  ;;  %v766_v63 = vmin.f32 %v702_v51, 6.0  ;;  %v491_v2 = vadd.f32 %v1824_v34, %v490_v58  ;;  %v619_v3 = vadd.f32 %v1824_v34, %v618_v59 }
  0xfe   :  { %v1366_v0 = vpack.c.bf16 %v736_v56, %v735_v54  ;;  %v1446_v1 = vpack.c.bf16 %v768_v57, %v767_v55  ;;  %v1564_v4 = vpop.f32.mrf.mxu0  ;;  %v1596_v5 = vpop.f32.mrf.mxu1  ;;  %v675_v8 = vmax.f32 %v499_v52, 0.0  ;;  %v707_v9 = vmax.f32 %v627_v53, 0.0 }
  0xff   :  { %v1361_v6 = vpack.c.bf16 %v734_v62, %v733_v60  ;;  %v1441_v7 = vpack.c.bf16 %v766_v63, %v765_v61  ;;  %v502_v10 = vadd.f32 %v1564_v4, %v1824_v34  ;;  %v630_v11 = vadd.f32 %v1596_v5, %v1824_v34 }
 0x100   :  { %1478 = vst [vmem:[#allocation2 + $0x58] sm:$0xff] %v1366_v0   ;;  %1494 = vst [vmem:[#allocation2 + $0xd8] sm:$0xff] %v1446_v1   ;;  %v493_v12 = vpop.f32.mrf.mxu0  ;;  %v621_v13 = vpop.f32.mrf.mxu1  ;;  %v673_v14 = vmax.f32 %v491_v2, 0.0  ;;  %v705_v15 = vmax.f32 %v619_v3, 0.0  ;;  %v739_v22 = vmin.f32 %v675_v8, 6.0  ;;  %v771_v23 = vmin.f32 %v707_v9, 6.0 }
 0x101   :  { %1477 = vst [vmem:[#allocation2 + $0x50] sm:$0xff] %v1361_v6   ;;  %1493 = vst [vmem:[#allocation2 + $0xd0] sm:$0xff] %v1441_v7   ;;  %v494_v16 = vadd.f32 %v1824_v34, %v493_v12  ;;  %v622_v17 = vadd.f32 %v1824_v34, %v621_v13  ;;  %v676_v18 = vmax.f32 %v502_v10, 0.0  ;;  %v708_v19 = vmax.f32 %v630_v11, 0.0 }
 0x102   :  { %v1567_v20 = vpop.f32.mrf.mxu0  ;;  %v1599_v21 = vpop.f32.mrf.mxu1  ;;  %v737_v32 = vmin.f32 %v673_v14, 6.0  ;;  %v769_v33 = vmin.f32 %v705_v15, 6.0 }
 0x103   :  { %v674_v24 = vmax.f32 %v494_v16, 0.0  ;;  %v706_v25 = vmax.f32 %v622_v17, 0.0  ;;  %v740_v26 = vmin.f32 %v676_v18, 6.0  ;;  %v772_v27 = vmin.f32 %v708_v19, 6.0 }
 0x104   :  { %v515_v28 = vadd.f32 %v1567_v20, %v1824_v34  ;;  %v643_v29 = vadd.f32 %v1599_v21, %v1824_v34  ;;  %v506_v30 = vpop.f32.mrf.mxu0  ;;  %v634_v31 = vpop.f32.mrf.mxu1 }
 0x105   :  { %v738_v35 = vmin.f32 %v674_v24, 6.0  ;;  %v770_v36 = vmin.f32 %v706_v25, 6.0  ;;  %v1376_v37 = vpack.c.bf16 %v740_v26, %v739_v22  ;;  %v1456_v38 = vpack.c.bf16 %v772_v27, %v771_v23 }
 0x106   :  { %v507_v39 = vadd.f32 %v1824_v34, %v506_v30  ;;  %v635_v40 = vadd.f32 %v1824_v34, %v634_v31  ;;  %v1568_v41 = vpop.f32.mrf.mxu0  ;;  %v1600_v42 = vpop.f32.mrf.mxu1  ;;  %v679_v45 = vmax.f32 %v515_v28, 0.0  ;;  %v711_v46 = vmax.f32 %v643_v29, 0.0 }
 0x107   :  { %v1371_v43 = vpack.c.bf16 %v738_v35, %v737_v32  ;;  %v1451_v44 = vpack.c.bf16 %v770_v36, %v769_v33  ;;  %1480 = vst [vmem:[#allocation2 + $0x68] sm:$0xff] %v1376_v37   ;;  %1496 = vst [vmem:[#allocation2 + $0xe8] sm:$0xff] %v1456_v38   ;;  %v518_v47 = vadd.f32 %v1568_v41, %v1824_v34 }
 0x108   :  { %v646_v48 = vadd.f32 %v1600_v42, %v1824_v34  ;;  %v509_v49 = vpop.f32.mrf.mxu0  ;;  %v637_v50 = vpop.f32.mrf.mxu1  ;;  %v677_v51 = vmax.f32 %v507_v39, 0.0  ;;  %v709_v52 = vmax.f32 %v635_v40, 0.0  ;;  %v743_v59 = vmin.f32 %v679_v45, 6.0 }
 0x109   :  { %1479 = vst [vmem:[#allocation2 + $0x60] sm:$0xff] %v1371_v43   ;;  %1495 = vst [vmem:[#allocation2 + $0xe0] sm:$0xff] %v1451_v44   ;;  %v510_v53 = vadd.f32 %v1824_v34, %v509_v49  ;;  %v638_v54 = vadd.f32 %v1824_v34, %v637_v50  ;;  %v680_v55 = vmax.f32 %v518_v47, 0.0  ;;  %v775_v60 = vmin.f32 %v711_v46, 6.0 }
 0x10a   :  { %v712_v56 = vmax.f32 %v646_v48, 0.0  ;;  %v741_v63 = vmin.f32 %v677_v51, 6.0  ;;  %v773_v0 = vmin.f32 %v709_v52, 6.0 }
 0x10b   :  { %v678_v57 = vmax.f32 %v510_v53, 0.0  ;;  %v710_v58 = vmax.f32 %v638_v54, 0.0  ;;  %v744_v61 = vmin.f32 %v680_v55, 6.0 }
 0x10c   :  { %v776_v62 = vmin.f32 %v712_v56, 6.0 }
 0x10d   :  { %v742_v1 = vmin.f32 %v678_v57, 6.0  ;;  %v774_v2 = vmin.f32 %v710_v58, 6.0  ;;  %v1386_v3 = vpack.c.bf16 %v744_v61, %v743_v59 }
 0x10e   :  { %v1466_v4 = vpack.c.bf16 %v776_v62, %v775_v60 }
 0x10f   :  { %v1381_v5 = vpack.c.bf16 %v742_v1, %v741_v63  ;;  %v1461_v6 = vpack.c.bf16 %v774_v2, %v773_v0  ;;  %1482 = vst [vmem:[#allocation2 + $0x78] sm:$0xff] %v1386_v3  }
 0x110   :  { %1498 = vst [vmem:[#allocation2 + $0xf8] sm:$0xff] %v1466_v4  }
 0x111   :  { %1481 = vst [vmem:[#allocation2 + $0x70] sm:$0xff] %v1381_v5   ;;  %1497 = vst [vmem:[#allocation2 + $0xf0] sm:$0xff] %v1461_v6  }
 0x112   :  { %1653 = shalt.err (!%p1650_p4)
}
 0x113   :  { %s1665_s26 = smov 64   ;;  %s1666_s27 = smov 4  }
 0x114   :  { %1108 = dma.vmem_to_hbm [thread:$0]  %s1103_s2, 4096, %s1896_s3, [#allocation3], %s1665_s26, %s1665_s26, %s1666_s27  }
 0x115   :  { %1662 = dma.done.wait [#allocation3], 4096  }
 0x116   :  { %1663 = vsyncadd [#allocation3], 4294963200 }
 0x117   :  { %1112 = vsyncpa [#allocation3], 1 }

</bundles_post_ra>
